<compile_context>
chip_gen: v7x
topology: tpu7x:2x2x1
jax: 0.10.0
libtpu: 0.0.40
codegen_flags: <defaults>
</compile_context>

<pallas_src>
import math

import jax
import jax.numpy as jnp
from jax.experimental import pallas as pl
from jax.experimental.pallas import tpu as pltpu


def _round_up(x, m):
    return ((x + m - 1) // m) * m


def _pick_tile(total, target):
    """Largest multiple of 128 that divides `total` (a 128-multiple) and <= target."""
    q = total // 128
    best = 128
    for d in range(1, q + 1):
        if q % d == 0 and 128 * d <= target:
            best = 128 * d
    return best


def _vmem_budget_bytes():
    # Physical VMEM per TensorCore: 128 MiB on v5e/v6e, 64 MiB on v7x.
    # Query so the resident plan and vmem_limit_bytes are sized per generation.
    try:
        cap = int(pltpu.get_tpu_info().vmem_capacity_bytes)
    except Exception:  # non-TPU tracing / older jax: assume the smallest (v7x)
        cap = 64 * 2**20
    return int(0.85 * cap)


# ----------------------------------------------------------------------------
# Kernels
# ----------------------------------------------------------------------------
def _filter_linear_resident_kernel(x_ref, wt_ref, ft_ref, b_ref, o_ref):
    """Plan A: W^T, F^T, bias fully resident; 1-D grid over batch tiles."""
    # t = x @ W^T  (f32 accumulation on the MXU)
    t = jnp.dot(x_ref[...], wt_ref[...], preferred_element_type=jnp.float32)
    # y = t @ F^T  (single cast of t to the compute dtype per batch tile)
    y = jnp.dot(t.astype(ft_ref.dtype), ft_ref[...],
                preferred_element_type=jnp.float32)
    o_ref[...] = (y + b_ref[...]).astype(o_ref.dtype)


def _filter_linear_tiled_kernel(x_ref, wt_ref, ft_ref, b_ref, o_ref, t_ref):
    """Plan B: F^T streamed in (out_p, tn) column tiles; t carried in scratch."""
    # t = x @ W^T, computed once per batch tile (j == 0) and stored in the
    # compute dtype so each j-step reuse needs no re-cast (review feedback).
    @pl.when(pl.program_id(1) == 0)
    def _():
        t_ref[...] = jnp.dot(
            x_ref[...], wt_ref[...], preferred_element_type=jnp.float32
        ).astype(t_ref.dtype)

    y = jnp.dot(t_ref[...], ft_ref[...], preferred_element_type=jnp.float32)
    o_ref[...] = (y + b_ref[...]).astype(o_ref.dtype)


# ----------------------------------------------------------------------------
# Parameter preparation (done ONCE per parameter set, not per forward call)
# ----------------------------------------------------------------------------
def prepare_filter_linear_params(filter_square_matrix, weight, bias=None, *,
                                 compute_dtype=jnp.bfloat16):
    out_features, in_features = weight.shape
    assert filter_square_matrix.shape == (out_features, out_features)

    in_p = _round_up(in_features, 128)
    out_p = _round_up(out_features, 128)

    wt = weight.T.astype(compute_dtype)                   # (in,  out)
    ft = filter_square_matrix.T.astype(compute_dtype)     # (out, out), 0/1

    wt_p = (jnp.zeros((in_p, out_p), compute_dtype)
            .at[:in_features, :out_features].set(wt))
    ft_p = (jnp.zeros((out_p, out_p), compute_dtype)
            .at[:out_features, :out_features].set(ft))
    b_p = jnp.zeros((1, out_p), jnp.float32)
    if bias is not None:
        b_p = b_p.at[0, :out_features].set(bias.astype(jnp.float32))

    return {
        "wt_p": wt_p, "ft_p": ft_p, "b_p": b_p,
        "in_features": in_features, "out_features": out_features,
        "in_p": in_p, "out_p": out_p, "compute_dtype": compute_dtype,
    }


# ----------------------------------------------------------------------------
# Forward pass
# ----------------------------------------------------------------------------
def filter_linear_apply(params, x, *, tm=None, tn=None):
    """x: (B, in_features) -> (B, out_features) in x.dtype."""
    B, in_features = x.shape
    assert in_features == params["in_features"]

    compute_dtype = params["compute_dtype"]
    in_p, out_p = params["in_p"], params["out_p"]
    out_features = params["out_features"]
    wt_p, ft_p, b_p = params["wt_p"], params["ft_p"], params["b_p"]

    out_dtype = x.dtype
    c_size = jnp.dtype(compute_dtype).itemsize
    o_size = jnp.dtype(out_dtype).itemsize

    # Batch tile: 8-aligned; avoid gross zero-row padding for small/odd B.
    b8 = _round_up(B, 8)
    if tm is None:
        tm = b8 if b8 <= 256 else 128
    tm = max(8, min(_round_up(tm, 8), b8))

    budget = _vmem_budget_bytes()

    # Plan A footprint: resident, single-buffered W^T / F^T / bias.
    def need_resident(tm_):
        return (2 * tm_ * in_p * c_size            # x (double-buffered)
                + in_p * out_p * c_size            # W^T (resident, 1 buffer)
                + out_p * out_p * c_size           # F^T (resident, 1 buffer)
                + out_p * 4                        # bias (resident, 1 buffer)
                + 2 * tm_ * out_p * o_size         # output (double-buffered)
                + 2 * tm_ * out_p * 4)             # f32 intermediates (t, y)

    # Plan B footprint: F^T streamed by output-column tile, t in scratch.
    def need_tiled(tm_, tn_):
        return (2 * tm_ * in_p * c_size
                + in_p * out_p * c_size            # W^T (resident, 1 buffer)
                + 2 * out_p * tn_ * c_size         # F^T column tiles
                + 2 * tn_ * 4                      # bias column tiles
                + 2 * tm_ * tn_ * o_size           # output tiles
                + tm_ * out_p * c_size             # t scratch (compute dtype)
                + tm_ * tn_ * 4)                   # f32 y intermediate

    use_resident = need_resident(tm) <= budget

    if not use_resident:
        tn_target = 512 if tn is None else tn
        tn = _pick_tile(out_p, max(128, tn_target))
        while need_tiled(tm, tn) > budget and tn > 128:
            tn = _pick_tile(out_p, tn // 2)
        while need_tiled(tm, tn) > budget and tm > 8:
            tm = max(8, _round_up(tm // 2, 8))
        # TODO(synk): if W^T alone exceeds the VMEM budget (extremely large
        # in*out), a K-streamed variant of the first matmul would be needed.

    b_pad = _round_up(B, tm)

    # Pad x only when needed (skip the extra HBM copy when already aligned).
    if b_pad == B and in_p == in_features and x.dtype == compute_dtype:
        x_p = x
    else:
        x_p = (jnp.zeros((b_pad, in_p), compute_dtype)
               .at[:B, :in_features].set(x.astype(compute_dtype)))

    flops = int(2 * b_pad * out_p * (in_p + out_p))
    bytes_accessed = int((x_p.size + wt_p.size + ft_p.size) * c_size
                         + b_p.size * 4 + b_pad * out_p * o_size)
    cost = pl.CostEstimate(flops=flops, transcendentals=0,
                           bytes_accessed=bytes_accessed)

    if use_resident:
        need = need_resident(tm)
        vmem_limit = int(min(budget, max(need * 3 // 2, 16 * 2**20)))
        out_padded = pl.pallas_call(
            _filter_linear_resident_kernel,
            out_shape=jax.ShapeDtypeStruct((b_pad, out_p), out_dtype),
            grid_spec=pltpu.PrefetchScalarGridSpec(
                num_scalar_prefetch=0,
                grid=(b_pad // tm,),
                in_specs=[
                    pl.BlockSpec((tm, in_p), lambda i: (i, 0)),       # x tile
                    pl.BlockSpec((in_p, out_p), lambda i: (0, 0),     # W^T
                                 pipeline_mode=pl.Buffered(1)),
                    pl.BlockSpec((out_p, out_p), lambda i: (0, 0),    # F^T
                                 pipeline_mode=pl.Buffered(1)),
                    pl.BlockSpec((1, out_p), lambda i: (0, 0),        # bias
                                 pipeline_mode=pl.Buffered(1)),
                ],
                out_specs=pl.BlockSpec((tm, out_p), lambda i: (i, 0)),
            ),
            compiler_params=pltpu.CompilerParams(
                dimension_semantics=("parallel",),   # clean megacore split
                vmem_limit_bytes=vmem_limit,
            ),
            cost_estimate=cost,
        )(x_p, wt_p, ft_p, b_p)
    else:
        need = need_tiled(tm, tn)
        vmem_limit = int(min(budget, max(need * 3 // 2, 16 * 2**20)))
        out_padded = pl.pallas_call(
            _filter_linear_tiled_kernel,
            out_shape=jax.ShapeDtypeStruct((b_pad, out_p), out_dtype),
            grid_spec=pltpu.PrefetchScalarGridSpec(
                num_scalar_prefetch=0,
                grid=(b_pad // tm, out_p // tn),
                in_specs=[
                    pl.BlockSpec((tm, in_p), lambda i, j: (i, 0)),    # x tile
                    pl.BlockSpec((in_p, out_p), lambda i, j: (0, 0),  # W^T
                                 pipeline_mode=pl.Buffered(1)),
                    pl.BlockSpec((out_p, tn), lambda i, j: (0, j)),   # F^T cols
                    pl.BlockSpec((1, tn), lambda i, j: (0, j)),       # bias cols
                ],
                out_specs=pl.BlockSpec((tm, tn), lambda i, j: (i, j)),
                scratch_shapes=[pltpu.VMEM((tm, out_p), compute_dtype)],
            ),
            compiler_params=pltpu.CompilerParams(
                # j carries the t scratch -> must stay innermost + "arbitrary".
                dimension_semantics=("parallel", "arbitrary"),
                vmem_limit_bytes=vmem_limit,
            ),
            cost_estimate=cost,
        )(x_p, wt_p, ft_p, b_p)

    return out_padded[:B, :out_features]


def filter_linear(x, filter_square_matrix, weight, bias=None, *,
                  compute_dtype=jnp.bfloat16, tm=None, tn=None):
    """One-shot convenience wrapper (prepare + apply)."""
    params = prepare_filter_linear_params(
        filter_square_matrix, weight, bias, compute_dtype=compute_dtype)
    return filter_linear_apply(params, x, tm=tm, tn=tn)


if __name__ == "__main__":
    # FilterLinear(in_features=32, out_features=32), batch=8.
    in_features, out_features, batch = 32, 32, 8

    key = jax.random.PRNGKey(0)
    k_x, k_w, k_b, k_f = jax.random.split(key, 4)

    # reset_parameters(): uniform(-stdv, stdv), stdv = 1/sqrt(in_features)
    stdv = 1.0 / math.sqrt(in_features)
    weight = jax.random.uniform(
        k_w, (out_features, in_features), jnp.float32, -stdv, stdv)
    bias = jax.random.uniform(k_b, (out_features,), jnp.float32, -stdv, stdv)
    # filter_square_matrix: 0/1 square mask.
    filter_square_matrix = jax.random.bernoulli(
        k_f, 0.5, (out_features, out_features)).astype(jnp.float32)
    x = jax.random.normal(k_x, (batch, in_features), jnp.float32)

    # Reference: F.linear(x, filter_square_matrix @ weight, bias)
    ref = x @ (filter_square_matrix @ weight).T + bias

    # bf16 fast path (default): params prepared ONCE, reused per forward call.
    params_bf16 = prepare_filter_linear_params(filter_square_matrix, weight, bias)
    out_bf16 = jax.block_until_ready(filter_linear_apply(params_bf16, x))
    assert out_bf16.shape == (batch, out_features)
    assert jnp.allclose(out_bf16, ref, atol=2e-2, rtol=2e-2)

    # f32 accuracy path (tight tolerance).
    params_f32 = prepare_filter_linear_params(
        filter_square_matrix, weight, bias, compute_dtype=jnp.float32)
    out_f32 = jax.block_until_ready(filter_linear_apply(params_f32, x))
    assert jnp.allclose(out_f32, ref, atol=1e-4, rtol=1e-4)

    print("KERNEL_OK")
</pallas_src>

<mosaic_0001>
module attributes {stable_mosaic.version = 11 : i64} {
  func.func @_filter_linear_resident_kernel(%arg0: i32, %arg1: memref<8x128xbf16, #tpu.memory_space<vmem>>, %arg2: memref<128x128xbf16, #tpu.memory_space<vmem>>, %arg3: memref<128x128xbf16, #tpu.memory_space<vmem>>, %arg4: memref<1x128xf32, #tpu.memory_space<vmem>>, %arg5: memref<8x128xf32, #tpu.memory_space<vmem>>) attributes {dimension_semantics = [#tpu.dimension_semantics<parallel>], iteration_bounds = array<i64: 1>, scalar_prefetch = 0 : i64, scratch_operands = 0 : i64, tpu.core_type = #tpu.core_type<tc>, window_params = [{transform_indices = @transform_0, window_bounds = array<i64: 8, 128>}, {pipeline_mode = #tpu.pipeline_mode<synchronous>, transform_indices = @transform_1, window_bounds = array<i64: 128, 128>}, {pipeline_mode = #tpu.pipeline_mode<synchronous>, transform_indices = @transform_2, window_bounds = array<i64: 128, 128>}, {pipeline_mode = #tpu.pipeline_mode<synchronous>, transform_indices = @transform_3, window_bounds = array<i64: 1, 128>}, {transform_indices = @transform_4, window_bounds = array<i64: 8, 128>}]} {
    %c0 = arith.constant 0 : index
    %c0_0 = arith.constant 0 : index
    %0 = vector.load %arg1[%c0, %c0_0] : memref<8x128xbf16, #tpu.memory_space<vmem>>, vector<8x128xbf16>
    %c0_1 = arith.constant 0 : index
    %c0_2 = arith.constant 0 : index
    %1 = vector.load %arg2[%c0_1, %c0_2] : memref<128x128xbf16, #tpu.memory_space<vmem>>, vector<128x128xbf16>
    %cst = arith.constant dense<0.000000e+00> : vector<8x128xf32>
    %2 = tpu.matmul %0, %1, %cst {dimension_numbers = #tpu.dot_dimension_numbers<[1], [0], [0], [1], [0, 0, 1, 1], [], []>} : vector<8x128xbf16>, vector<128x128xbf16>, vector<8x128xf32> -> vector<8x128xf32>
    %3 = arith.truncf %2 : vector<8x128xf32> to vector<8x128xbf16>
    %c0_3 = arith.constant 0 : index
    %c0_4 = arith.constant 0 : index
    %4 = vector.load %arg3[%c0_3, %c0_4] : memref<128x128xbf16, #tpu.memory_space<vmem>>, vector<128x128xbf16>
    %cst_5 = arith.constant dense<0.000000e+00> : vector<8x128xf32>
    %5 = tpu.matmul %3, %4, %cst_5 {dimension_numbers = #tpu.dot_dimension_numbers<[1], [0], [0], [1], [0, 0, 1, 1], [], []>} : vector<8x128xbf16>, vector<128x128xbf16>, vector<8x128xf32> -> vector<8x128xf32>
    %c0_6 = arith.constant 0 : index
    %c0_7 = arith.constant 0 : index
    %6 = vector.load %arg4[%c0_6, %c0_7] : memref<1x128xf32, #tpu.memory_space<vmem>>, vector<1x128xf32>
    %7 = vector.broadcast %6 : vector<1x128xf32> to vector<8x128xf32>
    %8 = arith.addf %5, %7 : vector<8x128xf32>
    %c0_8 = arith.constant 0 : index
    %c0_9 = arith.constant 0 : index
    %9 = vector.load %arg5[%c0_8, %c0_9] : memref<8x128xf32, #tpu.memory_space<vmem>>, vector<8x128xf32>
    tpu.vector_store %arg5[%c0_8, %c0_9], %8 {strides = array<i32>} : memref<8x128xf32, #tpu.memory_space<vmem>>, vector<8x128xf32>,
    return
  }
  func.func @transform_0(%arg0: i32) -> (i32, i32) {
    %c0_i32 = arith.constant 0 : i32
    %c0_i32_0 = arith.constant 0 : i32
    return %arg0, %c0_i32 : i32, i32
  }
  func.func @transform_1(%arg0: i32) -> (i32, i32) {
    %c0_i32 = arith.constant 0 : i32
    %c0_i32_0 = arith.constant 0 : i32
    %c0_i32_1 = arith.constant 0 : i32
    return %c0_i32, %c0_i32_0 : i32, i32
  }
  func.func @transform_2(%arg0: i32) -> (i32, i32) {
    %c0_i32 = arith.constant 0 : i32
    %c0_i32_0 = arith.constant 0 : i32
    %c0_i32_1 = arith.constant 0 : i32
    return %c0_i32, %c0_i32_0 : i32, i32
  }
  func.func @transform_3(%arg0: i32) -> (i32, i32) {
    %c0_i32 = arith.constant 0 : i32
    %c0_i32_0 = arith.constant 0 : i32
    %c0_i32_1 = arith.constant 0 : i32
    return %c0_i32, %c0_i32_0 : i32, i32
  }
  func.func @transform_4(%arg0: i32) -> (i32, i32) {
    %c0_i32 = arith.constant 0 : i32
    %c0_i32_0 = arith.constant 0 : i32
    return %arg0, %c0_i32 : i32, i32
  }
}

</mosaic_0001>

<bundles_post_ra>
// kernel: tpu_custom_call.1
= control target key start
LH: loop header
LB: loop body
LE: loop exit
PB: predicated region body
PF: predicated region fallthrough
CT: control target
= control target key end

     0   :  { %9 = vsyncpa [#allocation3], 0  ;;  %s575_s0 = inlined_call_operand.hbm [shape: bf16[8,128], index: 0, kind: input, shape index: {}]   ;;  %s576_s1 = inlined_call_operand.hbm [shape: bf16[128,128], index: 1, kind: input, shape index: {}]   ;;  %s577_s2 = inlined_call_operand.hbm [shape: bf16[128,128], index: 2, kind: input, shape index: {}]   ;;  %s578_s3 = inlined_call_operand.vmem [shape: f32[1,128], index: 3, kind: input, shape index: {}]   ;;  %s579_s4 = inlined_call_operand.hbm [shape: f32[8,128], index: 4, kind: output, shape index: {}]  }
   0x1   :  { %10 = vsyncpa [#allocation6], 0 }
   0x2   :  { %11 = vsyncpa [#allocation4], 0  ;;  %s485_s15 = smov [#allocation5]   ;;  %s391_s19 = scalar_lea.hbm %s576_s1, 1024 }
   0x3   :  { %s27_s16 = sshll.u32 %s485_s15, 4  ;;  %p392_p0 = scmp.ne.s32.totalorder %s576_s1, %s391_s19  ;;  %s28_s16 = int_to_ptr.vmem [resolvable:$true] %s27_s16 }
   0x4   :  { %p395_p1 = scmp.lt.u32.totalorder %s391_s19, %s576_s1 }
   0x6   :  { %p397_p2 = pnand %p395_p1, %p392_p0 }
   0x8   :  { %400 = shalt.err (!%p397_p2)
}
   0x9   :  { %s401_s24 = scalar_lea.vmem %s28_s16, 1024  ;;  %p406_p4 = scmp.lt.s32.totalorder %s28_s16, %s28_s16 }
   0xa   :  { %p402_p3 = scmp.ne.s32.totalorder %s28_s16, %s401_s24  ;;  %p407_p5 = scmp.lt.s32.totalorder %s401_s24, %s401_s24 }
   0xc   :  { %p408_p6 = por %p407_p5, %p406_p4 }
   0xe   :  { %p409_p7 = pnand %p408_p6, %p402_p3 }
  0x10   :  { %412 = shalt.err (!%p409_p7)
}
  0x11   :  { %s486_s25 = smov 64   ;;  %s487_s26 = smov 4  }
  0x12   :  { %33 = dma.hbm_to_vmem [thread:$0]  %s576_s1, 1024, %s28_s16, [#allocation6], %s486_s25, %s486_s25, %s487_s26  }
  0x13   :  { %s488_s29 = smov [#allocation2]   ;;  %s489_s5 = smov [#allocation7]  }
  0x14   :  { %s18_s30 = sshll.u32 %s488_s29, 4  ;;  %s39_s6 = sshll.u32 %s489_s5, 4  ;;  %s19_s30 = int_to_ptr.vmem [resolvable:$true] %s18_s30  ;;  %s40_s6 = int_to_ptr.vmem [resolvable:$true] %s39_s6 }
  0x15   :  { %s413_s9 = scalar_lea.hbm %s575_s0, 64 }
  0x16   :  { %p414_p8 = scmp.ne.s32.totalorder %s575_s0, %s413_s9  ;;  %p417_p9 = scmp.lt.u32.totalorder %s413_s9, %s575_s0 }
  0x18   :  { %p419_p10 = pnand %p417_p9, %p414_p8 }
  0x1a   :  { %422 = shalt.err (!%p419_p10)
}
  0x1b   :  { %s423_s1 = scalar_lea.vmem %s19_s30, 64  ;;  %p428_p12 = scmp.lt.s32.totalorder %s19_s30, %s19_s30 }
  0x1c   :  { %p424_p11 = scmp.ne.s32.totalorder %s19_s30, %s423_s1  ;;  %p429_p13 = scmp.lt.s32.totalorder %s423_s1, %s423_s1 }
  0x1e   :  { %p430_p0 = por %p429_p13, %p428_p12 }
  0x20   :  { %p431_p1 = pnand %p430_p0, %p424_p11 }
  0x22   :  { %434 = shalt.err (!%p431_p1)
}
  0x23   :  { %21 = dma.hbm_to_vmem [thread:$0]  %s575_s0, 64, %s19_s30, [#allocation3]  }
  0x24   :  { %s435_s18 = scalar_lea.hbm %s577_s2, 1024 }
  0x25   :  { %p436_p2 = scmp.ne.s32.totalorder %s577_s2, %s435_s18  ;;  %p439_p3 = scmp.lt.u32.totalorder %s435_s18, %s577_s2 }
  0x27   :  { %p441_p4 = pnand %p439_p3, %p436_p2 }
  0x29   :  { %444 = shalt.err (!%p441_p4)
}
  0x2a   :  { %s445_s23 = scalar_lea.vmem %s40_s6, 1024  ;;  %p450_p6 = scmp.lt.s32.totalorder %s40_s6, %s40_s6 }
  0x2b   :  { %p446_p5 = scmp.ne.s32.totalorder %s40_s6, %s445_s23  ;;  %p451_p7 = scmp.lt.s32.totalorder %s445_s23, %s445_s23 }
  0x2d   :  { %p452_p8 = por %p451_p7, %p450_p6 }
  0x2f   :  { %p453_p9 = pnand %p452_p8, %p446_p5 }
  0x31   :  { %456 = shalt.err (!%p453_p9)
}
  0x32   :  { %45 = dma.hbm_to_vmem [thread:$0]  %s577_s2, 1024, %s40_s6, [#allocation6], %s486_s25, %s486_s25, %s487_s26  }
  0x33   :  { %479 = dma.done.wait [#allocation3], 64  }
  0x34   :  { %480 = vsyncadd [#allocation3], 4294967232 }
  0x35   :  { %481 = dma.done.wait [#allocation6], 2048  }
  0x36   :  { %482 = vsyncadd [#allocation6], 4294965248  ;;  %v490_v0 = vmov 0.0   ;;  %vm491_vm0 = vmmov 0   ;;  %v375_v1 = vld [vmem:[#allocation5] sm:$0xff]   ;;  %v376_v2 = vld [vmem:[#allocation5 + $0x8] sm:$0xff]  }
  0x37   :  { %327 = vmatprep.subr.bf16.mxu0 %v490_v0  ;;  %343 = vmatprep.mubr.msk.bf16.mxu0 %vm491_vm0, %v490_v0  ;;  %v377_v3 = vld [vmem:[#allocation5 + $0x10] sm:$0xff]   ;;  %v383_v4 = vld [vmem:[#allocation7] sm:$0xff]   ;;  %v378_v5 = vld [vmem:[#allocation5 + $0x18] sm:$0xff]   ;;  %s492_s26 = smov [#allocation8]  }
  0x38   :  { %347 = vmatprep.subr.bf16.mxu1 %v490_v0  ;;  %363 = vmatprep.mubr.msk.bf16.mxu1 %vm491_vm0, %v490_v0  ;;  %v384_v6 = vld [vmem:[#allocation7 + $0x8] sm:$0xff]   ;;  %v379_v7 = vld [vmem:[#allocation5 + $0x20] sm:$0xff]   ;;  %v385_v8 = vld [vmem:[#allocation7 + $0x10] sm:$0xff]   ;;  %s282_s27 = sshll.u32 %s492_s26, 4  ;;  %s283_s27 = int_to_ptr.vmem [resolvable:$true] %s282_s27 }
  0x39   :  { %328 = vmatpush3.bf16.msra.mxu0 %v375_v1  ;;  %348 = vmatpush3.bf16.msra.mxu1 %v383_v4  ;;  %v380_v9 = vld [vmem:[#allocation5 + $0x28] sm:$0xff]   ;;  %v386_v10 = vld [vmem:[#allocation7 + $0x18] sm:$0xff]   ;;  %v381_v11 = vld [vmem:[#allocation5 + $0x30] sm:$0xff]   ;;  %s457_s28 = scalar_lea.vmem %s283_s27, 128  ;;  %p462_p11 = scmp.lt.s32.totalorder %s283_s27, %s283_s27 }
  0x3a   :  { %329 = vmatprep.subr.bf16.mxu0 %v490_v0  ;;  %349 = vmatprep.subr.bf16.mxu1 %v490_v0  ;;  %v387_v12 = vld [vmem:[#allocation7 + $0x20] sm:$0xff]   ;;  %v382_v13 = vld [vmem:[#allocation5 + $0x38] sm:$0xff]   ;;  %v388_v14 = vld [vmem:[#allocation7 + $0x28] sm:$0xff]   ;;  %p458_p10 = scmp.ne.s32.totalorder %s283_s27, %s457_s28  ;;  %p463_p12 = scmp.lt.s32.totalorder %s457_s28, %s457_s28 }
  0x3b   :  { %v58_v15 = vld [vmem:[#allocation2] sm:$0xf]  ;;  %v389_v16 = vld [vmem:[#allocation7 + $0x30] sm:$0xff]  }
  0x3c   :  { %v390_v17 = vld [vmem:[#allocation7 + $0x38] sm:$0xff]   ;;  %p464_p13 = por %p463_p12, %p462_p11 }
  0x3d   :  { %330 = vmatpush3.bf16.msra.mxu0 %v376_v2  ;;  %350 = vmatpush3.bf16.msra.mxu1 %v384_v6  ;;  %v300_v23 = vld [vmem:[%s578_s3] ss:$0 sm:$0xff] }
  0x3e   :  { %331 = vmatprep.subr.bf16.mxu0 %v490_v0  ;;  %351 = vmatprep.subr.bf16.mxu1 %v490_v0  ;;  %p465_p0 = pnand %p464_p13, %p458_p10 }
  0x41   :  { %332 = vmatpush3.bf16.msra.mxu0 %v377_v3  ;;  %352 = vmatpush3.bf16.msra.mxu1 %v385_v8 }
  0x42   :  { %333 = vmatprep.subr.bf16.mxu0 %v490_v0  ;;  %353 = vmatprep.subr.bf16.mxu1 %v490_v0 }
  0x45   :  { %334 = vmatpush3.bf16.msra.mxu0 %v378_v5  ;;  %354 = vmatpush3.bf16.msra.mxu1 %v386_v10 }
  0x46   :  { %335 = vmatprep.subr.bf16.mxu0 %v490_v0  ;;  %355 = vmatprep.subr.bf16.mxu1 %v490_v0 }
  0x49   :  { %336 = vmatpush3.bf16.msra.mxu0 %v379_v7  ;;  %356 = vmatpush3.bf16.msra.mxu1 %v387_v12 }
  0x4a   :  { %337 = vmatprep.subr.bf16.mxu0 %v490_v0  ;;  %357 = vmatprep.subr.bf16.mxu1 %v490_v0 }
  0x4d   :  { %338 = vmatpush3.bf16.msra.mxu0 %v380_v9  ;;  %358 = vmatpush3.bf16.msra.mxu1 %v388_v14 }
  0x4e   :  { %339 = vmatprep.subr.bf16.mxu0 %v490_v0  ;;  %359 = vmatprep.subr.bf16.mxu1 %v490_v0 }
  0x51   :  { %340 = vmatpush3.bf16.msra.mxu0 %v381_v11  ;;  %360 = vmatpush3.bf16.msra.mxu1 %v389_v16 }
  0x52   :  { %341 = vmatprep.subr.bf16.mxu0 %v490_v0  ;;  %361 = vmatprep.subr.bf16.mxu1 %v490_v0 }
  0x55   :  { %342 = vmatpush3.bf16.msra.mxu0 %v382_v13  ;;  %362 = vmatpush3.bf16.msra.mxu1 %v390_v17 }
  0x58   :  { %344 = vmatmul.mubr.bf16.vlgmr.msra.gmra.mrb[0].mxu0 %v58_v15 }
 0x12b   :  { %v157_v18 = vpop.f32.mrb[0].mxu0 }
 0x12c   :  { %v163_v19 = vpack.c.bf16 %v157_v18, %v157_v18  ;;  %v345_v20 = vpop.f32.mrb[1].mxu0 }
 0x12d   :  { %v160_v21 = vpop.f32.mrb[2].mxu0 }
 0x12e   :  { %v346_v22 = vpop.f32.mrb[3].mxu0  ;;  %364 = vmatmul.mubr.bf16.vlgmr.msra.gmra.mrb[0].mxu1 %v163_v19 }
 0x201   :  { %v269_v24 = vpop.f32.mrb[0].mxu1 }
 0x202   :  { %v270_v25 = vadd.f32 %v300_v23, %v269_v24  ;;  %v365_v26 = vpop.f32.mrb[1].mxu1 }
 0x203   :  { %v272_v27 = vpop.f32.mrb[2].mxu1 }
 0x204   :  { %275 = vst [vmem:[#allocation8] sm:$0xff] %v270_v25  ;;  %v366_v28 = vpop.f32.mrb[3].mxu1 }
 0x205   :  { %468 = shalt.err (!%p465_p0)
}
 0x206   :  { %s469_s3 = scalar_lea.hbm %s579_s4, 128 }
 0x207   :  { %p470_p1 = scmp.ne.s32.totalorder %s579_s4, %s469_s3  ;;  %p473_p2 = scmp.lt.u32.totalorder %s469_s3, %s579_s4 }
 0x209   :  { %p475_p3 = pnand %p473_p2, %p470_p1 }
 0x20b   :  { %478 = shalt.err (!%p475_p3)
}
 0x20c   :  { %285 = dma.vmem_to_hbm [thread:$0]  %s283_s27, 128, %s579_s4, [#allocation4]  }
 0x20d   :  { %483 = dma.done.wait [#allocation4], 128  }
 0x20e   :  { %484 = vsyncadd [#allocation4], 4294967168 }
 0x20f   :  { %289 = vsyncpa [#allocation3], 1 }
 0x210   :  { %290 = vsyncpa [#allocation6], 1 }
 0x211   :  { %291 = vsyncpa [#allocation4], 1 }

</bundles_post_ra>
